<compile_context>
chip_gen: v7x
topology: tpu7x:2x2x1
jax: 0.10.0
libtpu: 0.0.40
codegen_flags: <defaults>
</compile_context>

<pallas_src>
import functools

import jax
import jax.numpy as jnp
from jax import lax
from jax.experimental import pallas as pl
from jax.experimental.pallas import tpu as pltpu

_PI = 3.14159265358979323846
_PI_2 = _PI / 2.0
_PI_4 = _PI / 4.0
_TAN_PI_8 = 0.4142135623730950
_TAN_3PI_8 = 2.414213562373095


def _atan(x):
  # Cephes atanf (float32, ~1e-7 abs error); only uses ops with guaranteed
  # Mosaic lowering (abs / where / div / mul / add).
  s = jnp.where(x < 0.0, -1.0, 1.0)
  ax = jnp.abs(x)
  big = ax > _TAN_3PI_8
  mid = ax > _TAN_PI_8
  safe = jnp.where(ax == 0.0, 1.0, ax)
  xr = jnp.where(big, -1.0 / safe, jnp.where(mid, (ax - 1.0) / (ax + 1.0), ax))
  y0 = jnp.where(big, _PI_2, jnp.where(mid, _PI_4, 0.0))
  z = xr * xr
  poly = ((((8.05374449538e-2 * z - 1.38776856032e-1) * z
            + 1.99777106478e-1) * z - 3.33329491539e-1) * z * xr + xr)
  return s * (y0 + poly)


def _atan2(y, x):
  # TODO(synk): hand-rolled atan2 (Cephes) since a native atan2 lowering in
  # Mosaic is not guaranteed; accuracy ~1e-6 abs vs torch.atan2.  If the EUP
  # slot saturates on v5e, the divides here can be swapped for
  # x * pl.reciprocal(d, approx=True) at ~1e-3 relative accuracy cost.
  safe_x = jnp.where(x == 0.0, 1.0, x)
  base = _atan(y / safe_x)
  base = jnp.where(x == 0.0,
                   jnp.where(y > 0.0, _PI_2,
                             jnp.where(y < 0.0, -_PI_2, 0.0)),
                   base)
  corr = jnp.where((x < 0.0) & (y >= 0.0), _PI,
                   jnp.where((x < 0.0) & (y < 0.0), -_PI, 0.0))
  return base + corr


# --------------------------- fused forward kernel ----------------------------
def _euler_fused_kernel(r_ref, p_ref, w_im_ref, w_ord_ref, w_ln_ref, c_ref,
                        or_ref, op_ref, *, tb, apply_norm):
  r = r_ref[...]                          # (TB, IN)   flat (nin*D) layout
  p = p_ref[...]                          # (TB, IN)
  c = c_ref[...]                          # (7, OUT) packed small constants
  b_im, b_lam, b_theta = c[0:1], c[1:2], c[2:3]

  # polar decomposition (elementwise)
  lam = 0.5 * jnp.log(r * r + p * p + 1e-8)
  theta = _atan2(p, r)

  # one MXU dot for the im linear over [r; p], one for the orders matmul over
  # [lam; theta] (orders expanded to kron(orders, I_D) in the wrapper so the
  # flat lane-dense layout needs no transposes).
  rp = jnp.concatenate([r, p], axis=0)    # (2TB, IN)
  lt = jnp.concatenate([lam, theta], axis=0)

  lin = jnp.maximum(
      jnp.dot(rp, w_im_ref[...], preferred_element_type=jnp.float32) + b_im,
      0.0)                                # (2TB, OUT) relu(im(.))
  po = jnp.dot(lt, w_ord_ref[...], preferred_element_type=jnp.float32)

  lam_o = jnp.exp(po[:tb] + b_lam)        # (TB, OUT)
  theta_o = po[tb:] + b_theta

  o_r = lin[:tb] + lam_o * jnp.cos(theta_o)
  o_p = lin[tb:] + lam_o * jnp.sin(theta_o)

  if apply_norm:
    # LayerNorm over each D-sized field, done lane-dense with a per-field
    # averaging matrix kron(I_nout, 1/D): mu/var come back already broadcast.
    o2 = jnp.concatenate([o_r, o_p], axis=0)                    # (2TB, OUT)
    mu = jnp.dot(o2, w_ln_ref[...], preferred_element_type=jnp.float32)
    xc = o2 - mu
    var = jnp.dot(xc * xc, w_ln_ref[...], preferred_element_type=jnp.float32)
    xn = xc * lax.rsqrt(var + 1e-5)
    o_r = xn[:tb] * c[3:4] + c[4:5]       # gamma_r / beta_r (tiled over fields)
    o_p = xn[tb:] * c[5:6] + c[6:7]       # gamma_p / beta_p

  or_ref[...] = o_r                       # lane-dense (TB, OUT) stores
  op_ref[...] = o_p


# --------------------------------- wrapper -----------------------------------
def _pick_batch_tile(b, cap=256):
  if b <= cap:
    return b                              # full batch in one block (always legal)
  for tb in range(cap, 7, -1):            # prefer multiple-of-8 divisors
    if tb % 8 == 0 and b % tb == 0:
      return tb
  return b                                # fallback: whole batch per step


def euler_interaction_layer(r, p, params, *, feature_dim, apply_norm=True,
                            batch_tile=None):
  B, nin, D = r.shape
  assert D == feature_dim
  inshape = nin * D
  w_im_t = params["im_weight"].T.astype(jnp.float32)          # (IN, OUT)
  outshape = w_im_t.shape[1]
  nout = outshape // D

  # orders matmul in flat layout: out[b, o*D+d] = sum_i x[b, i*D+d] * orders[i,o]
  w_ord = jnp.kron(params["inter_orders"].astype(jnp.float32),
                   jnp.eye(D, dtype=jnp.float32))              # (IN, OUT)
  # per-field mean matrix for LayerNorm (broadcast mean over each D block)
  w_ln = jnp.kron(jnp.eye(nout, dtype=jnp.float32),
                  jnp.full((D, D), 1.0 / D, jnp.float32))      # (OUT, OUT)

  # packed small constants: (7, OUT)
  b_im = params["im_bias"].reshape(outshape)
  b_lam = jnp.transpose(params["bias_lam"][0]).reshape(outshape)     # [o*D+d]
  b_theta = jnp.transpose(params["bias_theta"][0]).reshape(outshape)
  g_r = jnp.tile(params["norm_r_weight"], nout)
  be_r = jnp.tile(params["norm_r_bias"], nout)
  g_p = jnp.tile(params["norm_p_weight"], nout)
  be_p = jnp.tile(params["norm_p_bias"], nout)
  consts = jnp.stack([b_im, b_lam, b_theta, g_r, be_r, g_p, be_p],
                     axis=0).astype(jnp.float32)               # (7, OUT)

  # lane-dense flat layout in/out of the kernel
  r2 = r.reshape(B, inshape).astype(jnp.float32)
  p2 = p.reshape(B, inshape).astype(jnp.float32)

  tb = batch_tile if batch_tile is not None else _pick_batch_tile(B)
  assert B % tb == 0, (B, tb)
  grid = (B // tb,)

  flops = (2 * 2 * (2 * B) * inshape * outshape        # im + orders dots
           + 2 * 2 * (2 * B) * outshape * outshape)    # LN mean/var dots
  transcendentals = B * inshape * 2 + B * outshape * 3  # log,atan / exp,cos,sin
  bytes_accessed = 4 * (2 * B * inshape + 2 * B * outshape
                        + 2 * inshape * outshape + outshape * outshape
                        + 7 * outshape)

  def _const2(shape):
    return pl.BlockSpec(shape, lambda b: (0, 0))       # resident across steps

  o_r_flat, o_p_flat = pl.pallas_call(
      functools.partial(_euler_fused_kernel, tb=tb, apply_norm=apply_norm),
      out_shape=(jax.ShapeDtypeStruct((B, outshape), jnp.float32),
                 jax.ShapeDtypeStruct((B, outshape), jnp.float32)),
      grid_spec=pltpu.PrefetchScalarGridSpec(
          num_scalar_prefetch=0, grid=grid,
          in_specs=[
              pl.BlockSpec((tb, inshape), lambda b: (b, 0)),
              pl.BlockSpec((tb, inshape), lambda b: (b, 0)),
              _const2((inshape, outshape)),             # im weight (resident)
              _const2((inshape, outshape)),             # kron(orders, I_D)
              _const2((outshape, outshape)),            # LN mean matrix
              _const2((7, outshape)),                   # packed biases/gammas
          ],
          out_specs=(pl.BlockSpec((tb, outshape), lambda b: (b, 0)),
                     pl.BlockSpec((tb, outshape), lambda b: (b, 0)))),
      compiler_params=pltpu.CompilerParams(
          dimension_semantics=("parallel",),            # megacore on v7x
          vmem_limit_bytes=32 * 1024 * 1024),
      cost_estimate=pl.CostEstimate(
          flops=flops, transcendentals=transcendentals,
          bytes_accessed=bytes_accessed),
  )(r2, p2, w_im_t, w_ord, w_ln, consts)

  return o_r_flat.reshape(B, nout, D), o_p_flat.reshape(B, nout, D)


# -------------------------- plain-JAX reference (check) ----------------------
def reference(r, p, params, feature_dim, apply_norm=True):
  B, D = r.shape[0], feature_dim
  lam = r ** 2 + p ** 2 + 1e-8
  theta = jnp.arctan2(p, r)
  lam = 0.5 * jnp.log(lam.reshape(B, -1, D))
  theta = theta.reshape(B, -1, D)
  lam, theta = jnp.swapaxes(lam, -2, -1), jnp.swapaxes(theta, -2, -1)
  lam = lam @ params["inter_orders"] + params["bias_lam"]
  theta = theta @ params["inter_orders"] + params["bias_theta"]
  lam = jnp.exp(lam)
  lam, theta = jnp.swapaxes(lam, -2, -1), jnp.swapaxes(theta, -2, -1)
  rf = jax.nn.relu(r.reshape(B, -1) @ params["im_weight"].T + params["im_bias"])
  pf = jax.nn.relu(p.reshape(B, -1) @ params["im_weight"].T + params["im_bias"])
  rf, pf = rf.reshape(B, -1, D), pf.reshape(B, -1, D)
  o_r = rf + lam * jnp.cos(theta)
  o_p = pf + lam * jnp.sin(theta)
  if apply_norm:
    def ln(x, w, b):
      mu = x.mean(-1, keepdims=True)
      var = ((x - mu) ** 2).mean(-1, keepdims=True)
      return (x - mu) / jnp.sqrt(var + 1e-5) * w + b
    o_r = ln(o_r, params["norm_r_weight"], params["norm_r_bias"])
    o_p = ln(o_p, params["norm_p_weight"], params["norm_p_bias"])
  return o_r, o_p


if __name__ == "__main__":
  B, NIN, NOUT, D = 2, 8, 4, 16          # embedding_size = 16
  INSHAPE, OUTSHAPE = NIN * D, NOUT * D  # inshape=128, outshape=64

  key = jax.random.PRNGKey(0)
  k_r, k_p, k_ord, k_w, k_b, k_bl, k_bt = jax.random.split(key, 7)

  r = 0.1 * jax.random.normal(k_r, (B, NIN, D), jnp.float32)
  p = 0.1 * jax.random.normal(k_p, (B, NIN, D), jnp.float32)

  # deterministic parameter init mirroring the module's __init__ shapes
  params = {
      # inshape != outshape branch: softmax(randn/0.01, dim=0)
      "inter_orders": jax.nn.softmax(
          jax.random.normal(k_ord, (NIN, NOUT), jnp.float32) / 0.01, axis=0),
      "im_weight": 0.01 * jax.random.normal(k_w, (OUTSHAPE, INSHAPE), jnp.float32),
      "im_bias": jax.random.uniform(
          k_b, (OUTSHAPE,), jnp.float32,
          -1.0 / (INSHAPE ** 0.5), 1.0 / (INSHAPE ** 0.5)),
      "bias_lam": 0.01 * jax.random.normal(k_bl, (1, D, NOUT), jnp.float32),
      "bias_theta": 0.01 * jax.random.normal(k_bt, (1, D, NOUT), jnp.float32),
      "norm_r_weight": jnp.ones((D,), jnp.float32),
      "norm_r_bias": jnp.zeros((D,), jnp.float32),
      "norm_p_weight": jnp.ones((D,), jnp.float32),
      "norm_p_bias": jnp.zeros((D,), jnp.float32),
  }

  o_r, o_p = euler_interaction_layer(r, p, params, feature_dim=D, apply_norm=True)
  o_r, o_p = jax.block_until_ready((o_r, o_p))

  ref_r, ref_p = reference(r, p, params, D, apply_norm=True)
  err_r = float(jnp.max(jnp.abs(o_r - ref_r)))
  err_p = float(jnp.max(jnp.abs(o_p - ref_p)))
  # Tolerance kept at 5e-3: the atan/LayerNorm paths alone are ~1e-6, but the
  # f32 MXU pass-count under DEFAULT dot precision is backend-dependent.
  assert err_r < 5e-3 and err_p < 5e-3, (err_r, err_p)

  print("KERNEL_OK")
</pallas_src>

<mosaic_0001>
module attributes {stable_mosaic.version = 11 : i64} {
  func.func @_euler_fused_kernel(%arg0: i32, %arg1: memref<2x128xf32, #tpu.memory_space<vmem>>, %arg2: memref<2x128xf32, #tpu.memory_space<vmem>>, %arg3: memref<128x64xf32, #tpu.memory_space<vmem>>, %arg4: memref<128x64xf32, #tpu.memory_space<vmem>>, %arg5: memref<64x64xf32, #tpu.memory_space<vmem>>, %arg6: memref<7x64xf32, #tpu.memory_space<vmem>>, %arg7: memref<2x64xf32, #tpu.memory_space<vmem>>, %arg8: memref<2x64xf32, #tpu.memory_space<vmem>>) attributes {dimension_semantics = [#tpu.dimension_semantics<parallel>], iteration_bounds = array<i64: 1>, scalar_prefetch = 0 : i64, scratch_operands = 0 : i64, tpu.core_type = #tpu.core_type<tc>, window_params = [{transform_indices = @transform_0, window_bounds = array<i64: 2, 128>}, {transform_indices = @transform_1, window_bounds = array<i64: 2, 128>}, {pipeline_mode = #tpu.pipeline_mode<synchronous>, transform_indices = @transform_2, window_bounds = array<i64: 128, 64>}, {pipeline_mode = #tpu.pipeline_mode<synchronous>, transform_indices = @transform_3, window_bounds = array<i64: 128, 64>}, {pipeline_mode = #tpu.pipeline_mode<synchronous>, transform_indices = @transform_4, window_bounds = array<i64: 64, 64>}, {pipeline_mode = #tpu.pipeline_mode<synchronous>, transform_indices = @transform_5, window_bounds = array<i64: 7, 64>}, {transform_indices = @transform_6, window_bounds = array<i64: 2, 64>}, {transform_indices = @transform_7, window_bounds = array<i64: 2, 64>}]} {
    %c0 = arith.constant 0 : index
    %c0_0 = arith.constant 0 : index
    %0 = vector.load %arg1[%c0, %c0_0] : memref<2x128xf32, #tpu.memory_space<vmem>>, vector<2x128xf32>
    %c0_1 = arith.constant 0 : index
    %c0_2 = arith.constant 0 : index
    %1 = vector.load %arg2[%c0_1, %c0_2] : memref<2x128xf32, #tpu.memory_space<vmem>>, vector<2x128xf32>
    %c0_3 = arith.constant 0 : index
    %c0_4 = arith.constant 0 : index
    %2 = vector.load %arg6[%c0_3, %c0_4] : memref<7x64xf32, #tpu.memory_space<vmem>>, vector<7x64xf32>
    %3 = vector.extract_strided_slice %2 {offsets = [0, 0], sizes = [1, 64], strides = [1, 1]} : vector<7x64xf32> to vector<1x64xf32>
    %4 = vector.extract_strided_slice %2 {offsets = [1, 0], sizes = [1, 64], strides = [1, 1]} : vector<7x64xf32> to vector<1x64xf32>
    %5 = vector.extract_strided_slice %2 {offsets = [2, 0], sizes = [1, 64], strides = [1, 1]} : vector<7x64xf32> to vector<1x64xf32>
    %6 = arith.mulf %0, %0 : vector<2x128xf32>
    %7 = arith.mulf %1, %1 : vector<2x128xf32>
    %8 = arith.addf %6, %7 : vector<2x128xf32>
    %cst = arith.constant 9.99999993E-9 : f32
    %9 = vector.broadcast %cst : f32 to vector<2x128xf32>
    %10 = arith.addf %8, %9 : vector<2x128xf32>
    %11 = math.log %10 : vector<2x128xf32>
    %cst_5 = arith.constant 5.000000e-01 : f32
    %12 = vector.broadcast %cst_5 : f32 to vector<2x128xf32>
    %13 = arith.mulf %12, %11 : vector<2x128xf32>
    %cst_6 = arith.constant 0.000000e+00 : f32
    %14 = vector.broadcast %cst_6 : f32 to vector<2x128xf32>
    %15 = arith.cmpf oeq, %0, %14 : vector<2x128xf32>
    %cst_7 = arith.constant 1.000000e+00 : f32
    %16 = vector.broadcast %cst_7 : f32 to vector<2x128xf32>
    %17 = arith.select %15, %16, %0 : vector<2x128xi1>, vector<2x128xf32>
    %18 = arith.divf %1, %17 : vector<2x128xf32>
    %cst_8 = arith.constant 0.000000e+00 : f32
    %19 = vector.broadcast %cst_8 : f32 to vector<2x128xf32>
    %20 = arith.cmpf olt, %18, %19 : vector<2x128xf32>
    %cst_9 = arith.constant -1.000000e+00 : f32
    %cst_10 = arith.constant 1.000000e+00 : f32
    %21 = vector.broadcast %cst_9 : f32 to vector<2x128xf32>
    %22 = vector.broadcast %cst_10 : f32 to vector<2x128xf32>
    %23 = arith.select %20, %21, %22 : vector<2x128xi1>, vector<2x128xf32>
    %24 = math.absf %18 : vector<2x128xf32>
    %cst_11 = arith.constant 2.41421366 : f32
    %25 = vector.broadcast %cst_11 : f32 to vector<2x128xf32>
    %26 = arith.cmpf ogt, %24, %25 : vector<2x128xf32>
    %cst_12 = arith.constant 0.414213568 : f32
    %27 = vector.broadcast %cst_12 : f32 to vector<2x128xf32>
    %28 = arith.cmpf ogt, %24, %27 : vector<2x128xf32>
    %cst_13 = arith.constant 0.000000e+00 : f32
    %29 = vector.broadcast %cst_13 : f32 to vector<2x128xf32>
    %30 = arith.cmpf oeq, %24, %29 : vector<2x128xf32>
    %cst_14 = arith.constant 1.000000e+00 : f32
    %31 = vector.broadcast %cst_14 : f32 to vector<2x128xf32>
    %32 = arith.select %30, %31, %24 : vector<2x128xi1>, vector<2x128xf32>
    %cst_15 = arith.constant -1.000000e+00 : f32
    %33 = vector.broadcast %cst_15 : f32 to vector<2x128xf32>
    %34 = arith.divf %33, %32 : vector<2x128xf32>
    %cst_16 = arith.constant 1.000000e+00 : f32
    %35 = vector.broadcast %cst_16 : f32 to vector<2x128xf32>
    %36 = arith.subf %24, %35 : vector<2x128xf32>
    %cst_17 = arith.constant 1.000000e+00 : f32
    %37 = vector.broadcast %cst_17 : f32 to vector<2x128xf32>
    %38 = arith.addf %24, %37 : vector<2x128xf32>
    %39 = arith.divf %36, %38 : vector<2x128xf32>
    %40 = arith.select %28, %39, %24 : vector<2x128xi1>, vector<2x128xf32>
    %41 = arith.select %26, %34, %40 : vector<2x128xi1>, vector<2x128xf32>
    %cst_18 = arith.constant 0.785398185 : f32
    %cst_19 = arith.constant 0.000000e+00 : f32
    %42 = vector.broadcast %cst_18 : f32 to vector<2x128xf32>
    %43 = vector.broadcast %cst_19 : f32 to vector<2x128xf32>
    %44 = arith.select %28, %42, %43 : vector<2x128xi1>, vector<2x128xf32>
    %cst_20 = arith.constant 1.57079637 : f32
    %45 = vector.broadcast %cst_20 : f32 to vector<2x128xf32>
    %46 = arith.select %26, %45, %44 : vector<2x128xi1>, vector<2x128xf32>
    %47 = arith.mulf %41, %41 : vector<2x128xf32>
    %cst_21 = arith.constant 0.0805374458 : f32
    %48 = vector.broadcast %cst_21 : f32 to vector<2x128xf32>
    %49 = arith.mulf %48, %47 : vector<2x128xf32>
    %cst_22 = arith.constant 0.138776854 : f32
    %50 = vector.broadcast %cst_22 : f32 to vector<2x128xf32>
    %51 = arith.subf %49, %50 : vector<2x128xf32>
    %52 = arith.mulf %51, %47 : vector<2x128xf32>
    %cst_23 = arith.constant 0.199777111 : f32
    %53 = vector.broadcast %cst_23 : f32 to vector<2x128xf32>
    %54 = arith.addf %52, %53 : vector<2x128xf32>
    %55 = arith.mulf %54, %47 : vector<2x128xf32>
    %cst_24 = arith.constant 0.333329499 : f32
    %56 = vector.broadcast %cst_24 : f32 to vector<2x128xf32>
    %57 = arith.subf %55, %56 : vector<2x128xf32>
    %58 = arith.mulf %57, %47 : vector<2x128xf32>
    %59 = arith.mulf %58, %41 : vector<2x128xf32>
    %60 = arith.addf %59, %41 : vector<2x128xf32>
    %61 = arith.addf %46, %60 : vector<2x128xf32>
    %62 = arith.mulf %23, %61 : vector<2x128xf32>
    %cst_25 = arith.constant 0.000000e+00 : f32
    %63 = vector.broadcast %cst_25 : f32 to vector<2x128xf32>
    %64 = arith.cmpf oeq, %0, %63 : vector<2x128xf32>
    %cst_26 = arith.constant 0.000000e+00 : f32
    %65 = vector.broadcast %cst_26 : f32 to vector<2x128xf32>
    %66 = arith.cmpf ogt, %1, %65 : vector<2x128xf32>
    %cst_27 = arith.constant 0.000000e+00 : f32
    %67 = vector.broadcast %cst_27 : f32 to vector<2x128xf32>
    %68 = arith.cmpf olt, %1, %67 : vector<2x128xf32>
    %cst_28 = arith.constant -1.57079637 : f32
    %cst_29 = arith.constant 0.000000e+00 : f32
    %69 = vector.broadcast %cst_28 : f32 to vector<2x128xf32>
    %70 = vector.broadcast %cst_29 : f32 to vector<2x128xf32>
    %71 = arith.select %68, %69, %70 : vector<2x128xi1>, vector<2x128xf32>
    %cst_30 = arith.constant 1.57079637 : f32
    %72 = vector.broadcast %cst_30 : f32 to vector<2x128xf32>
    %73 = arith.select %66, %72, %71 : vector<2x128xi1>, vector<2x128xf32>
    %74 = arith.select %64, %73, %62 : vector<2x128xi1>, vector<2x128xf32>
    %cst_31 = arith.constant 0.000000e+00 : f32
    %75 = vector.broadcast %cst_31 : f32 to vector<2x128xf32>
    %76 = arith.cmpf olt, %0, %75 : vector<2x128xf32>
    %cst_32 = arith.constant 0.000000e+00 : f32
    %77 = vector.broadcast %cst_32 : f32 to vector<2x128xf32>
    %78 = arith.cmpf oge, %1, %77 : vector<2x128xf32>
    %79 = arith.andi %76, %78 : vector<2x128xi1>
    %cst_33 = arith.constant 0.000000e+00 : f32
    %80 = vector.broadcast %cst_33 : f32 to vector<2x128xf32>
    %81 = arith.cmpf olt, %0, %80 : vector<2x128xf32>
    %cst_34 = arith.constant 0.000000e+00 : f32
    %82 = vector.broadcast %cst_34 : f32 to vector<2x128xf32>
    %83 = arith.cmpf olt, %1, %82 : vector<2x128xf32>
    %84 = arith.andi %81, %83 : vector<2x128xi1>
    %cst_35 = arith.constant -3.14159274 : f32
    %cst_36 = arith.constant 0.000000e+00 : f32
    %85 = vector.broadcast %cst_35 : f32 to vector<2x128xf32>
    %86 = vector.broadcast %cst_36 : f32 to vector<2x128xf32>
    %87 = arith.select %84, %85, %86 : vector<2x128xi1>, vector<2x128xf32>
    %cst_37 = arith.constant 3.14159274 : f32
    %88 = vector.broadcast %cst_37 : f32 to vector<2x128xf32>
    %89 = arith.select %79, %88, %87 : vector<2x128xi1>, vector<2x128xf32>
    %90 = arith.addf %74, %89 : vector<2x128xf32>
    %91 = tpu.concatenate %0, %1 in 0 : vector<2x128xf32>, vector<2x128xf32> -> vector<4x128xf32>
    %92 = tpu.concatenate %13, %90 in 0 : vector<2x128xf32>, vector<2x128xf32> -> vector<4x128xf32>
    %c0_38 = arith.constant 0 : index
    %c0_39 = arith.constant 0 : index
    %93 = vector.load %arg3[%c0_38, %c0_39] : memref<128x64xf32, #tpu.memory_space<vmem>>, vector<128x64xf32>
    %cst_40 = arith.constant dense<0.000000e+00> : vector<4x64xf32>
    %94 = tpu.matmul %91, %93, %cst_40 {dimension_numbers = #tpu.dot_dimension_numbers<[1], [0], [0], [1], [0, 0, 1, 1], [], []>} : vector<4x128xf32>, vector<128x64xf32>, vector<4x64xf32> -> vector<4x64xf32>
    %95 = vector.broadcast %3 : vector<1x64xf32> to vector<4x64xf32>
    %96 = arith.addf %94, %95 : vector<4x64xf32>
    %cst_41 = arith.constant 0.000000e+00 : f32
    %97 = vector.broadcast %cst_41 : f32 to vector<4x64xf32>
    %98 = arith.maximumf %96, %97 : vector<4x64xf32>
    %c0_42 = arith.constant 0 : index
    %c0_43 = arith.constant 0 : index
    %99 = vector.load %arg4[%c0_42, %c0_43] : memref<128x64xf32, #tpu.memory_space<vmem>>, vector<128x64xf32>
    %cst_44 = arith.constant dense<0.000000e+00> : vector<4x64xf32>
    %100 = tpu.matmul %92, %99, %cst_44 {dimension_numbers = #tpu.dot_dimension_numbers<[1], [0], [0], [1], [0, 0, 1, 1], [], []>} : vector<4x128xf32>, vector<128x64xf32>, vector<4x64xf32> -> vector<4x64xf32>
    %101 = vector.extract_strided_slice %100 {offsets = [0, 0], sizes = [2, 64], strides = [1, 1]} : vector<4x64xf32> to vector<2x64xf32>
    %102 = vector.broadcast %4 : vector<1x64xf32> to vector<2x64xf32>
    %103 = arith.addf %101, %102 : vector<2x64xf32>
    %104 = math.exp %103 : vector<2x64xf32>
    %105 = vector.extract_strided_slice %100 {offsets = [2, 0], sizes = [2, 64], strides = [1, 1]} : vector<4x64xf32> to vector<2x64xf32>
    %106 = vector.broadcast %5 : vector<1x64xf32> to vector<2x64xf32>
    %107 = arith.addf %105, %106 : vector<2x64xf32>
    %108 = vector.extract_strided_slice %98 {offsets = [0, 0], sizes = [2, 64], strides = [1, 1]} : vector<4x64xf32> to vector<2x64xf32>
    %109 = math.cos %107 : vector<2x64xf32>
    %110 = arith.mulf %104, %109 : vector<2x64xf32>
    %111 = arith.addf %108, %110 : vector<2x64xf32>
    %112 = vector.extract_strided_slice %98 {offsets = [2, 0], sizes = [2, 64], strides = [1, 1]} : vector<4x64xf32> to vector<2x64xf32>
    %113 = math.sin %107 : vector<2x64xf32>
    %114 = arith.mulf %104, %113 : vector<2x64xf32>
    %115 = arith.addf %112, %114 : vector<2x64xf32>
    %116 = tpu.concatenate %111, %115 in 0 : vector<2x64xf32>, vector<2x64xf32> -> vector<4x64xf32>
    %c0_45 = arith.constant 0 : index
    %c0_46 = arith.constant 0 : index
    %117 = vector.load %arg5[%c0_45, %c0_46] : memref<64x64xf32, #tpu.memory_space<vmem>>, vector<64x64xf32>
    %cst_47 = arith.constant dense<0.000000e+00> : vector<4x64xf32>
    %118 = tpu.matmul %116, %117, %cst_47 {dimension_numbers = #tpu.dot_dimension_numbers<[1], [0], [0], [1], [0, 0, 1, 1], [], []>} : vector<4x64xf32>, vector<64x64xf32>, vector<4x64xf32> -> vector<4x64xf32>
    %119 = arith.subf %116, %118 : vector<4x64xf32>
    %120 = arith.mulf %119, %119 : vector<4x64xf32>
    %c0_48 = arith.constant 0 : index
    %c0_49 = arith.constant 0 : index
    %121 = vector.load %arg5[%c0_48, %c0_49] : memref<64x64xf32, #tpu.memory_space<vmem>>, vector<64x64xf32>
    %cst_50 = arith.constant dense<0.000000e+00> : vector<4x64xf32>
    %122 = tpu.matmul %120, %121, %cst_50 {dimension_numbers = #tpu.dot_dimension_numbers<[1], [0], [0], [1], [0, 0, 1, 1], [], []>} : vector<4x64xf32>, vector<64x64xf32>, vector<4x64xf32> -> vector<4x64xf32>
    %cst_51 = arith.constant 9.99999974E-6 : f32
    %123 = vector.broadcast %cst_51 : f32 to vector<4x64xf32>
    %124 = arith.addf %122, %123 : vector<4x64xf32>
    %125 = math.rsqrt %124 : vector<4x64xf32>
    %126 = arith.mulf %119, %125 : vector<4x64xf32>
    %127 = vector.extract_strided_slice %126 {offsets = [0, 0], sizes = [2, 64], strides = [1, 1]} : vector<4x64xf32> to vector<2x64xf32>
    %128 = vector.extract_strided_slice %2 {offsets = [3, 0], sizes = [1, 64], strides = [1, 1]} : vector<7x64xf32> to vector<1x64xf32>
    %129 = vector.broadcast %128 : vector<1x64xf32> to vector<2x64xf32>
    %130 = arith.mulf %127, %129 : vector<2x64xf32>
    %131 = vector.extract_strided_slice %2 {offsets = [4, 0], sizes = [1, 64], strides = [1, 1]} : vector<7x64xf32> to vector<1x64xf32>
    %132 = vector.broadcast %131 : vector<1x64xf32> to vector<2x64xf32>
    %133 = arith.addf %130, %132 : vector<2x64xf32>
    %134 = vector.extract_strided_slice %126 {offsets = [2, 0], sizes = [2, 64], strides = [1, 1]} : vector<4x64xf32> to vector<2x64xf32>
    %135 = vector.extract_strided_slice %2 {offsets = [5, 0], sizes = [1, 64], strides = [1, 1]} : vector<7x64xf32> to vector<1x64xf32>
    %136 = vector.broadcast %135 : vector<1x64xf32> to vector<2x64xf32>
    %137 = arith.mulf %134, %136 : vector<2x64xf32>
    %138 = vector.extract_strided_slice %2 {offsets = [6, 0], sizes = [1, 64], strides = [1, 1]} : vector<7x64xf32> to vector<1x64xf32>
    %139 = vector.broadcast %138 : vector<1x64xf32> to vector<2x64xf32>
    %140 = arith.addf %137, %139 : vector<2x64xf32>
    %c0_52 = arith.constant 0 : index
    %c0_53 = arith.constant 0 : index
    %141 = vector.load %arg7[%c0_52, %c0_53] : memref<2x64xf32, #tpu.memory_space<vmem>>, vector<2x64xf32>
    tpu.vector_store %arg7[%c0_52, %c0_53], %133 {strides = array<i32>} : memref<2x64xf32, #tpu.memory_space<vmem>>, vector<2x64xf32>,
    %c0_54 = arith.constant 0 : index
    %c0_55 = arith.constant 0 : index
    %142 = vector.load %arg8[%c0_54, %c0_55] : memref<2x64xf32, #tpu.memory_space<vmem>>, vector<2x64xf32>
    tpu.vector_store %arg8[%c0_54, %c0_55], %140 {strides = array<i32>} : memref<2x64xf32, #tpu.memory_space<vmem>>, vector<2x64xf32>,
    return
  }
  func.func @transform_0(%arg0: i32) -> (i32, i32) {
    %c0_i32 = arith.constant 0 : i32
    %c0_i32_0 = arith.constant 0 : i32
    return %arg0, %c0_i32 : i32, i32
  }
  func.func @transform_1(%arg0: i32) -> (i32, i32) {
    %c0_i32 = arith.constant 0 : i32
    %c0_i32_0 = arith.constant 0 : i32
    return %arg0, %c0_i32 : i32, i32
  }
  func.func @transform_2(%arg0: i32) -> (i32, i32) {
    %c0_i32 = arith.constant 0 : i32
    %c0_i32_0 = arith.constant 0 : i32
    %c0_i32_1 = arith.constant 0 : i32
    return %c0_i32, %c0_i32_0 : i32, i32
  }
  func.func @transform_3(%arg0: i32) -> (i32, i32) {
    %c0_i32 = arith.constant 0 : i32
    %c0_i32_0 = arith.constant 0 : i32
    %c0_i32_1 = arith.constant 0 : i32
    return %c0_i32, %c0_i32_0 : i32, i32
  }
  func.func @transform_4(%arg0: i32) -> (i32, i32) {
    %c0_i32 = arith.constant 0 : i32
    %c0_i32_0 = arith.constant 0 : i32
    %c0_i32_1 = arith.constant 0 : i32
    return %c0_i32, %c0_i32_0 : i32, i32
  }
  func.func @transform_5(%arg0: i32) -> (i32, i32) {
    %c0_i32 = arith.constant 0 : i32
    %c0_i32_0 = arith.constant 0 : i32
    %c0_i32_1 = arith.constant 0 : i32
    return %c0_i32, %c0_i32_0 : i32, i32
  }
  func.func @transform_6(%arg0: i32) -> (i32, i32) {
    %c0_i32 = arith.constant 0 : i32
    %c0_i32_0 = arith.constant 0 : i32
    return %arg0, %c0_i32 : i32, i32
  }
  func.func @transform_7(%arg0: i32) -> (i32, i32) {
    %c0_i32 = arith.constant 0 : i32
    %c0_i32_0 = arith.constant 0 : i32
    return %arg0, %c0_i32 : i32, i32
  }
}

</mosaic_0001>

<bundles_post_ra>
// kernel: tpu_custom_call.1
= control target key start
LH: loop header
LB: loop body
LE: loop exit
PB: predicated region body
PF: predicated region fallthrough
CT: control target
= control target key end

     0   :  { %13 = vsyncpa [#allocation3], 0  ;;  %v1037_v3 = vmov 0.0|0.0   ;;  %vm1038_vm0 = vmmov 0   ;;  %v1039_v6 = vmov 0.0   ;;  %s1368_s0 = inlined_call_operand.vmem [shape: f32[2,128], index: 0, kind: input, shape index: {}]   ;;  %s1369_s1 = inlined_call_operand.vmem [shape: f32[2,128], index: 1, kind: input, shape index: {}]   ;;  %s1370_s2 = inlined_call_operand.vmem [shape: f32[128,64], index: 2, kind: input, shape index: {}]   ;;  %s1371_s3 = inlined_call_operand.vmem [shape: f32[128,64], index: 3, kind: input, shape index: {}]   ;;  %s1372_s4 = inlined_call_operand.vmem [shape: f32[64,64], index: 4, kind: input, shape index: {}]   ;;  %s1373_s5 = inlined_call_operand.vmem [shape: f32[7,64], index: 5, kind: input, shape index: {}]   ;;  %s1374_s6 = inlined_call_operand.hbm [shape: f32[2,64], index: 6, kind: output, shape index: {0}]   ;;  %s1375_s7 = inlined_call_operand.hbm [shape: f32[2,64], index: 7, kind: output, shape index: {1}]  }
   0x1   :  { %v182_v0 = vld [vmem:[%s1371_s3] sm:$0xff]  ;;  %v183_v1 = vld [vmem:[%s1371_s3 + $0x8] sm:$0xff]  ;;  %v184_v2 = vld [vmem:[%s1371_s3 + $0x10] sm:$0xff]  ;;  %909 = vmatprep.subr.bf16.mxu1 %v1037_v3  ;;  %844 = vmatprep.mubr.msk.f32.mxu1 %vm1038_vm0, %v1039_v6 }
   0x2   :  { %v910_v4 = vpack.c.bf16 %v183_v1, %v182_v0  ;;  %v185_v5 = vld [vmem:[%s1371_s3 + $0x18] sm:$0xff]  ;;  %885 = vmatprep.subr.bf16.mxu0 %v1037_v3  ;;  %809 = vmatprep.mubr.msk.f32.mxu0 %vm1038_vm0, %v1039_v6  ;;  %v186_v8 = vld [vmem:[%s1371_s3 + $0x20] sm:$0xff]  ;;  %v187_v9 = vld [vmem:[%s1371_s3 + $0x28] sm:$0xff] }
   0x3   :  { %v913_v7 = vpack.c.bf16 %v185_v5, %v184_v2  ;;  %v1117_v10 = vld [vmem:[%s1368_s0] sm:$0x3]  ;;  %v92_v12 = vld [vmem:[%s1370_s2 + $0x8] sm:$0xff]  ;;  %v916_v13 = vpack.c.bf16 %v187_v9, %v186_v8  ;;  %v188_v14 = vld [vmem:[%s1371_s3 + $0x30] sm:$0xff] }
   0x4   :  { %911 = vmatpush3.bf16.msra.mxu1 %v910_v4  ;;  %vm37_vm1 = vcmp.eq.f32.partialorder %v1117_v10, 0.0  ;;  %v91_v11 = vld [vmem:[%s1370_s2] sm:$0xff]  ;;  %v189_v16 = vld [vmem:[%s1371_s3 + $0x38] sm:$0xff]  ;;  %v93_v17 = vld [vmem:[%s1370_s2 + $0x10] sm:$0xff] }
   0x5   :  { %912 = vmatprep.subr.bf16.mxu1 %v1037_v3  ;;  %v38_v15 = vsel %vm37_vm1, 1.0, %v1117_v10  ;;  %v94_v18 = vld [vmem:[%s1370_s2 + $0x18] sm:$0xff]  ;;  %v886_v19 = vpack.c.bf16 %v92_v12, %v91_v11  ;;  %v919_v20 = vpack.c.bf16 %v189_v16, %v188_v14  ;;  %v190_v21 = vld [vmem:[%s1371_s3 + $0x40] sm:$0xff]  ;;  %v191_v23 = vld [vmem:[%s1371_s3 + $0x48] sm:$0xff] }
   0x6   :  { %973 = vrcp.f32 %v38_v15  ;;  %v889_v22 = vpack.c.bf16 %v94_v18, %v93_v17  ;;  %v95_v24 = vld [vmem:[%s1370_s2 + $0x20] sm:$0xff]  ;;  %v96_v25 = vld [vmem:[%s1370_s2 + $0x28] sm:$0xff] }
   0x7   :  { %887 = vmatpush3.bf16.msra.mxu0 %v886_v19 }
   0x8   :  { %914 = vmatpush3.bf16.msra.mxu1 %v913_v7  ;;  %888 = vmatprep.subr.bf16.mxu0 %v1037_v3 }
   0x9   :  { %915 = vmatprep.subr.bf16.mxu1 %v1037_v3 }
   0xc   :  { %917 = vmatpush3.bf16.msra.mxu1 %v916_v13 }
   0xd   :  { %918 = vmatprep.subr.bf16.mxu1 %v1037_v3 }
   0xe   :  { %14 = vsyncpa [#allocation5], 0  ;;  %v922_v26 = vpack.c.bf16 %v191_v23, %v190_v21  ;;  %v192_v27 = vld [vmem:[%s1371_s3 + $0x50] sm:$0xff]  ;;  %v193_v28 = vld [vmem:[%s1371_s3 + $0x58] sm:$0xff]  ;;  %890 = vmatpush3.bf16.msra.mxu0 %v889_v22  ;;  %v892_v29 = vpack.c.bf16 %v96_v25, %v95_v24  ;;  %vm85_vm4 = vcmask 1041408   ;;  %v30_v63 = vmul.f32 %v1117_v10, %v1117_v10  ;;  %s1048_s11 = smov [#allocation4]  }
   0xf   :  { %v1166_v30 = vld [vmem:[%s1369_s1] sm:$0x3]  ;;  %891 = vmatprep.subr.bf16.mxu0 %v1037_v3  ;;  %v97_v31 = vld [vmem:[%s1370_s2 + $0x30] sm:$0xff]  ;;  %v98_v32 = vld [vmem:[%s1370_s2 + $0x38] sm:$0xff]  ;;  %v925_v34 = vpack.c.bf16 %v193_v28, %v192_v27  ;;  %vm75_vm7 = vcmp.lt.f32.partialorder %v1117_v10, 0.0  ;;  %v1040_v24 = vmov 1.0  }
  0x10   :  { %920 = vmatpush3.bf16.msra.mxu1 %v919_v20  ;;  %v974_v33 = vpop.eup %973  ;;  %v194_v35 = vld [vmem:[%s1371_s3 + $0x60] sm:$0xff]  ;;  %v895_v37 = vpack.c.bf16 %v98_v32, %v97_v31  ;;  %v195_v38 = vld [vmem:[%s1371_s3 + $0x68] sm:$0xff]  ;;  %v196_v43 = vld [vmem:[%s1371_s3 + $0x70] sm:$0xff]  ;;  %v83_v59 = vrot.slane %v1166_v30, 6  ;;  %v31_v0 = vmul.f32 %v1166_v30, %v1166_v30  ;;  %vm71_vm6 = vcmp.lt.f32.partialorder %v1166_v30, 0.0 }
  0x11   :  { %921 = vmatprep.subr.bf16.mxu1 %v1037_v3  ;;  %v1179_v36 = vmul.f32 %v974_v33, %v1166_v30  ;;  %v99_v39 = vld [vmem:[%s1370_s2 + $0x40] sm:$0xff]  ;;  %v100_v40 = vld [vmem:[%s1370_s2 + $0x48] sm:$0xff]  ;;  %v928_v42 = vpack.c.bf16 %v195_v38, %v194_v35  ;;  %v197_v45 = vld [vmem:[%s1371_s3 + $0x78] sm:$0xff]  ;;  %vm76_vm9 = vcmp.ge.f32.partialorder %v1166_v30, 0.0  ;;  %vm70_vm11 = vcmp.gt.f32.partialorder %v1166_v30, 0.0  ;;  %s700_s3 = sshll.u32 %s1048_s11, 4  ;;  %s701_s3 = int_to_ptr.vmem [resolvable:$true] %s700_s3 }
  0x12   :  { %893 = vmatpush3.bf16.msra.mxu0 %v892_v29  ;;  %v898_v44 = vpack.c.bf16 %v100_v40, %v99_v39  ;;  %v101_v47 = vld [vmem:[%s1370_s2 + $0x50] sm:$0xff]  ;;  %v102_v48 = vld [vmem:[%s1370_s2 + $0x58] sm:$0xff]  ;;  %v931_v50 = vpack.c.bf16 %v197_v45, %v196_v43  ;;  %v103_v52 = vld [vmem:[%s1370_s2 + $0x60] sm:$0xff]  ;;  %v86_v2 = vsel %vm85_vm4, %v1117_v10, %v83_v59  ;;  %v32_v7 = vadd.f32 %v31_v0, %v30_v63 }
  0x13   :  { %894 = vmatprep.subr.bf16.mxu0 %v1037_v3  ;;  %v1193_v41 = vand.u32 2147483647, %v1179_v36  ;;  %v901_v51 = vpack.c.bf16 %v102_v48, %v101_v47  ;;  %v104_v53 = vld [vmem:[%s1370_s2 + $0x68] sm:$0xff]  ;;  %v105_v55 = vld [vmem:[%s1370_s2 + $0x70] sm:$0xff]  ;;  %v106_v56 = vld [vmem:[%s1370_s2 + $0x78] sm:$0xff]  ;;  %vm41_vm8 = vcmp.lt.f32.partialorder %v1179_v36, 0.0 }
  0x14   :  { %923 = vmatpush3.bf16.msra.mxu1 %v922_v26  ;;  %v904_v54 = vpack.c.bf16 %v104_v53, %v103_v52  ;;  %v907_v58 = vpack.c.bf16 %v106_v56, %v105_v55  ;;  %v33_v11 = vadd.f32 1e-08, %v32_v7  ;;  %vm78_vm10 = vmand %vm75_vm7, %vm71_vm6  ;;  %v72_v23 = vsel %vm71_vm6, -1.5707964, %v1039_v6  ;;  %v502_v38 = vld [vmem:[%s1372_s4 + $0x8] sm:$0xff]  ;;  %v503_v10 = vld [vmem:[%s1372_s4 + $0x10] sm:$0xff] }
  0x15   :  { %924 = vmatprep.subr.bf16.mxu1 %v1037_v3  ;;  %vm46_vm2 = vcmp.eq.f32.partialorder %v1193_v41, 0.0  ;;  %v51_v46 = vadd.f32 1.0, %v1193_v41  ;;  %v712_v57 = vadd.f32 -1.0, %v1193_v41  ;;  %vm45_vm3 = vcmp.gt.f32.partialorder %v1193_v41, 0.41421357  ;;  %vm77_vm12 = vmand %vm75_vm7, %vm76_vm9  ;;  %v504_v40 = vld [vmem:[%s1372_s4 + $0x18] sm:$0xff] }
  0x16   :  { %896 = vmatpush3.bf16.msra.mxu0 %v895_v37  ;;  %v47_v49 = vsel %vm46_vm2, 1.0, %v1193_v41  ;;  %vm44_vm5 = vcmp.gt.f32.partialorder %v1193_v41, 2.4142137  ;;  %v56_v17 = vsel %vm45_vm3, 0.7853982, %v1039_v6  ;;  %v42_v25 = vsel %vm41_vm8, -1.0, %v1040_v24 }
  0x17   :  { %897 = vmatprep.subr.bf16.mxu0 %v1037_v3  ;;  %975 = vrcp.f32 %v47_v49  ;;  %v57_v20 = vsel %vm44_vm5, 1.5707964, %v56_v17  ;;  %v79_v26 = vsel %vm78_vm10, -3.1415927, %v1039_v6  ;;  %v73_v29 = vsel %vm70_vm11, 1.5707964, %v72_v23 }
  0x18   :  { %926 = vmatpush3.bf16.msra.mxu1 %v925_v34  ;;  %977 = vrcp.f32 %v51_v46  ;;  %v80_v32 = vsel %vm77_vm12, 3.1415927, %v79_v26  ;;  %v501_v37 = vld [vmem:[%s1372_s4] sm:$0xff]  ;;  %v508_v45 = vld [vmem:[%s1372_s4 + $0x38] sm:$0xff]  ;;  %v107_v49 = vlaneseq }
  0x19   :  { %927 = vmatprep.subr.bf16.mxu1 %v1037_v3  ;;  %979 = vlog2.f32 %v33_v11  ;;  %v934_v39 = vpack.c.bf16 %v502_v38, %v501_v37  ;;  %v1302_v52 = vld [vmem:[%s1373_s5] sm:$0x7f] }
  0x1a   :  { %899 = vmatpush3.bf16.msra.mxu0 %v898_v44  ;;  %v507_v44 = vld [vmem:[%s1372_s4 + $0x30] sm:$0xff] }
  0x1b   :  { %900 = vmatprep.subr.bf16.mxu0 %v1037_v3  ;;  %v943_v46 = vpack.c.bf16 %v508_v45, %v507_v44 }
  0x1c   :  { %929 = vmatpush3.bf16.msra.mxu1 %v928_v42  ;;  %v506_v42 = vld [vmem:[%s1372_s4 + $0x28] sm:$0xff] }
  0x1d   :  { %930 = vmatprep.subr.bf16.mxu1 %v1037_v3 }
  0x1e   :  { %902 = vmatpush3.bf16.msra.mxu0 %v901_v51 }
  0x1f   :  { %903 = vmatprep.subr.bf16.mxu0 %v1037_v3 }
  0x20   :  { %932 = vmatpush3.bf16.msra.mxu1 %v931_v50  ;;  %v1296_v50 = vshrl.u32 %v107_v49, 7 }
  0x21   :  { %945 = vmatprep.subr.bf16.mxu1 %v1037_v3  ;;  %v976_v60 = vpop.eup %975 }
  0x22   :  { %905 = vmatpush3.bf16.msra.mxu0 %v904_v54  ;;  %v978_v61 = vpop.eup %977  ;;  %v49_v62 = vmul.f32 -1.0, %v976_v60  ;;  %v277_v51 = vsub.s32 2, %v1296_v50 }
  0x23   :  { %906 = vmatprep.subr.bf16.mxu0 %v1037_v3  ;;  %v53_v1 = vmul.f32 %v978_v61, %v712_v57  ;;  %v980_v21 = vpop.eup %979 }
  0x24   :  { %v35_v28 = vmul.f32 0.6931472, %v980_v21  ;;  %v278_v53 = vrot.slane %v1302_v52, %v277_v51 }
  0x25   :  { %v54_v4 = vsel %vm45_vm3, %v53_v1, %v1193_v41  ;;  %v937_v41 = vpack.c.bf16 %v504_v40, %v503_v10 }
  0x26   :  { %908 = vmatpush3.bf16.msra.mxu0 %v907_v58  ;;  %v55_v5 = vsel %vm44_vm5, %v49_v62, %v54_v4  ;;  %v36_v34 = vmul.f32 0.5, %v35_v28 }
  0x27   :  { %933 = vmatprep.subr.bf16.mxu0 %v1037_v3  ;;  %v58_v8 = vmul.f32 %v55_v5, %v55_v5 }
  0x29   :  { %810 = vmatmul.mubr.f32.vlgmr.msra.gmra.mrb[0].mxu0 %v86_v2  ;;  %v59_v9 = vmul.f32 0.080537446, %v58_v8  ;;  %v1041_v2 = vmov 683565275  }
  0x2a   :  { %863 = vmatprep.mubr.msk.f32.mxu0 %vm1038_vm0, %v1039_v6  ;;  %935 = vmatpush3.bf16.msra.mxu0 %v934_v39 }
  0x2b   :  { %v713_v12 = vadd.f32 -0.13877685, %v59_v9  ;;  %936 = vmatprep.subr.bf16.mxu0 %v1037_v3  ;;  %v1043_v9 = vmov 2131351028  }
  0x2d   :  { %v61_v13 = vmul.f32 %v713_v12, %v58_v8 }
  0x2e   :  { %938 = vmatpush3.bf16.msra.mxu0 %v937_v41 }
  0x2f   :  { %v62_v14 = vadd.f32 0.19977711, %v61_v13  ;;  %939 = vmatprep.subr.bf16.mxu0 %v1037_v3  ;;  %v1044_v13 = vmov 2102212464  }
  0x31   :  { %v63_v15 = vmul.f32 %v62_v14, %v58_v8 }
  0x33   :  { %v714_v16 = vadd.f32 -0.3333295, %v63_v15 }
  0x35   :  { %v65_v18 = vmul.f32 %v714_v16, %v58_v8  ;;  %v1045_v16 = vmov 920167782  }
  0x37   :  { %v66_v19 = vmul.f32 %v65_v18, %v55_v5 }
  0x39   :  { %v67_v22 = vadd.f32 %v66_v19, %v55_v5  ;;  %v1042_v5 = vmov 2475754826   ;;  %v1046_v19 = vmov 1326507024  }
  0x3b   :  { %v68_v27 = vadd.f32 %v67_v22, %v57_v20 }
  0x3d   :  { %v69_v31 = vmul.f32 %v68_v27, %v42_v25 }
  0x3f   :  { %v74_v33 = vsel %vm37_vm1, %v73_v29, %v69_v31 }
  0x40   :  { %v81_v35 = vadd.f32 %v80_v32, %v74_v33 }
  0x42   :  { %v88_v36 = vrot.slane %v81_v35, 6 }
  0x44   :  { %v90_v30 = vsel %vm85_vm4, %v36_v34, %v88_v36 }
  0x45   :  { %845 = vmatmul.mubr.f32.vlgmr.msra.gmra.mrb[0].mxu1 %v90_v30 }
  0x46   :  { %882 = vmatprep.mubr.msk.f32.mxu1 %vm1038_vm0, %v1039_v6  ;;  %947 = vmatpush3.bf16.msra.mxu1 %v934_v39  ;;  %v505_v6 = vld [vmem:[%s1372_s4 + $0x20] sm:$0xff]  ;;  %s1047_s4 = smov [#allocation2]  }
  0x47   :  { %948 = vmatprep.subr.bf16.mxu1 %v1037_v3  ;;  %v940_v43 = vpack.c.bf16 %v506_v42, %v505_v6  ;;  %s690_s5 = sshll.u32 %s1047_s4, 4  ;;  %s691_s5 = int_to_ptr.vmem [resolvable:$true] %s690_s5 }
  0x48   :  { %s989_s12 = scalar_lea.vmem %s691_s5, 32  ;;  %p994_p1 = scmp.lt.s32.totalorder %s691_s5, %s691_s5 }
  0x49   :  { %941 = vmatpush3.bf16.msra.mxu0 %v940_v43  ;;  %p990_p0 = scmp.ne.s32.totalorder %s691_s5, %s989_s12  ;;  %p995_p2 = scmp.lt.s32.totalorder %s989_s12, %s989_s12 }
  0x4a   :  { %950 = vmatpush3.bf16.msra.mxu1 %v937_v41  ;;  %942 = vmatprep.subr.bf16.mxu0 %v1037_v3 }
  0x4b   :  { %951 = vmatprep.subr.bf16.mxu1 %v1037_v3  ;;  %p996_p3 = por %p995_p2, %p994_p1 }
  0x4d   :  { %944 = vmatpush3.bf16.msra.mxu0 %v943_v46  ;;  %p997_p4 = pnand %p996_p3, %p990_p0 }
  0x4e   :  { %953 = vmatpush3.bf16.msra.mxu1 %v940_v43 }
  0x4f   :  { %954 = vmatprep.subr.bf16.mxu1 %v1037_v3 }
  0x52   :  { %956 = vmatpush3.bf16.msra.mxu1 %v943_v46 }
  0xfc   :  { %v1294_v47 = vpop.f32.mrb[0].mxu0 }
  0xfd   :  { %v811_v48 = vpop.f32.mrb[1].mxu0 }
 0x118   :  { %v1305_v54 = vpop.f32.mrb[0].mxu1 }
 0x119   :  { %v1308_v3 = vadd.f32 %v278_v53, %v1305_v54  ;;  %v846_v55 = vpop.f32.mrb[1].mxu1 }
 0x11b   :  { %v283_v56 = vand.u32 2139095040, %v1308_v3  ;;  %v280_v60 = vand.u32 2147483647, %v1308_v3  ;;  %vm282_vm5 = vcmp.lt.s32.totalorder %v1308_v3, 0 }
 0x11d   :  { %v284_v57 = vshrl.u32 %v283_v56, 23  ;;  %v287_v63 = vand.u32 8388607, %v280_v60  ;;  %vm281_vm6 = vcmp.le.f32.partialorder %v280_v60, 0.7853982 }
 0x11f   :  { %v715_v58 = vadd.s32 4294967169, %v284_v57  ;;  %v288_v21 = vor.u32 8388608, %v287_v63 }
 0x121   :  { %v290_v59 = vadd.s32 1, %v715_v58  ;;  %v328_v36 = vshll.u32 %v288_v21, 8 }
 0x123   :  { %vm291_vm13 = vcmp.gt.s32.totalorder %v290_v59, 0 }
 0x124   :  { %v292_v61 = vsel %vm291_vm13, %v290_v59, 0  ;;  %vm372_vm13 = vweird.f32 %v1308_v3 }
 0x125   :  { %v294_v62 = vand.u32 31, %v292_v61  ;;  %v293_v1 = vshrl.u32 %v292_v61, 5 }
 0x127   :  { %v295_v0 = vsub.s32 32, %v294_v62  ;;  %v297_v4 = vshll.u32 %v1041_v2, %v294_v62  ;;  %v300_v7 = vshll.u32 %v1042_v5, %v294_v62  ;;  %v303_v12 = vshll.u32 %v1043_v9, %v294_v62 }
 0x128   :  { %v306_v15 = vshll.u32 %v1044_v13, %v294_v62  ;;  %v309_v18 = vshll.u32 %v1045_v16, %v294_v62  ;;  %vm312_vm14 = vcmp.lt.s32.totalorder %v293_v1, 1  ;;  %vm315_vm15 = vcmp.lt.s32.totalorder %v293_v1, 4 }
 0x129   :  { %v298_v8 = vshrl.u32 %v1042_v5, %v295_v0  ;;  %v301_v11 = vshrl.u32 %v1043_v9, %v295_v0  ;;  %v304_v14 = vshrl.u32 %v1044_v13, %v295_v0  ;;  %v307_v17 = vshrl.u32 %v1045_v16, %v295_v0 }
 0x12a   :  { %v310_v20 = vshrl.u32 %v1046_v19, %v295_v0  ;;  %v296_v31 = vshrl.u32 %v1041_v2, %v295_v0  ;;  %vm314_vm0 = vcmp.lt.s32.totalorder %v293_v1, 3  ;;  %vm313_vm1 = vcmp.lt.s32.totalorder %v293_v1, 2 }
 0x12b   :  { %v299_v22 = vor.u32 %v298_v8, %v297_v4  ;;  %v302_v23 = vor.u32 %v301_v11, %v300_v7  ;;  %v305_v24 = vor.u32 %v304_v14, %v303_v12  ;;  %v308_v25 = vor.u32 %v307_v17, %v306_v15 }
 0x12c   :  { %v311_v26 = vor.u32 %v310_v20, %v309_v18  ;;  %v270_v8 = vsub.s32 1, %v1296_v50 }
 0x12d   :  { %v317_v27 = vsel %vm315_vm15, %v305_v24, 2102212464  ;;  %v320_v28 = vsel %vm312_vm14, %v299_v22, %v302_v23  ;;  %v324_v29 = vsel %vm312_vm14, %v302_v23, %v305_v24  ;;  %v321_v32 = vsel %vm315_vm15, %v308_v25, 920167782 }
 0x12e   :  { %v325_v33 = vsel %vm315_vm15, %v311_v26, 1326507024  ;;  %v322_v34 = vsel %vm314_vm0, %v305_v24, %v321_v32  ;;  %v316_v30 = vsel %vm312_vm14, %v296_v31, %v299_v22  ;;  %v318_v37 = vsel %vm314_vm0, %v302_v23, %v317_v27 }
 0x12f   :  { %v326_v35 = vsel %vm314_vm0, %v308_v25, %v325_v33  ;;  %v323_v38 = vsel %vm313_vm1, %v320_v28, %v322_v34  ;;  %v319_v42 = vsel %vm313_vm1, %v316_v30, %v318_v37  ;;  %v271_v14 = vrot.slane %v1302_v52, %v270_v8 }
 0x130   :  { %v327_v10 = vsel %vm313_vm1, %v324_v29, %v326_v35  ;;  %v1317_v41 = vmul.u32.u64.low %v328_v36, %v323_v38  ;;  %v1318_v6 = vmul.u32.u64.high %v328_v36, %v323_v38, %v1317_v41  ;;  %v335_v44 = vmul.u32 %v328_v36, %v319_v42 }
 0x131   :  { %v1314_v39 = vmul.u32.u64.low %v328_v36, %v327_v10  ;;  %v1315_v40 = vmul.u32.u64.high %v328_v36, %v327_v10, %v1314_v39  ;;  %v272_v19 = vadd.f32 %v271_v14, %v1305_v54  ;;  %v109_v22 = vsub.s32 0, %v1296_v50 }
 0x132   :  { %v338_v43 = vadd.s32 1, %v1318_v6  ;;  %vm509_vm14 = vcmask 523264   ;;  %vm682_vm15 = vcmask 519170  }
 0x133   :  { %vm337_vm2 = vc.u32 %v1315_v40, %v1317_v41  ;;  %v336_v61 = vadd.s32 %v1317_v41, %v1315_v40  ;;  %v273_v21 = vmul.f32 1.442695, %v272_v19  ;;  %v110_v24 = vrot.slane %v1302_v52, %v109_v22 }
 0x134   :  { %v339_v45 = vsel %vm337_vm2, %v338_v43, %v1318_v6 }
 0x135   :  { %v340_v46 = vadd.s32 %v339_v45, %v335_v44  ;;  %v178_v29 = vadd.f32 %v1294_v47, %v110_v24 }
 0x137   :  { %v341_v48 = vadd.s32 536870912, %v340_v46  ;;  %v181_v38 = vmax.f32 %v178_v29, 0.0 }
 0x139   :  { %v342_v49 = vshrl.u32 %v341_v48, 30 }
 0x13b   :  { %v343_v51 = vshll.u32 %v342_v49, 30  ;;  %v366_v13 = vsub.s32 4, %v342_v49 }
 0x13d   :  { %v344_v53 = vsub.s32 %v340_v46, %v343_v51  ;;  %v367_v17 = vsel %vm282_vm5, %v366_v13, %v342_v49 }
 0x13e   :  { %v369_v20 = vsel %vm281_vm6, 0, %v367_v17 }
 0x13f   :  { %v346_v55 = vsub.s32 0, %v344_v53  ;;  %v481_v23 = vadd.s32 3, %v369_v20  ;;  %v373_v25 = vand.u32 3, %v369_v20 }
 0x141   :  { %v716_v56 = vmin.u32 %v346_v55, %v344_v53  ;;  %v482_v26 = vand.u32 3, %v481_v23  ;;  %vm378_vm7 = vcmp.eq.s32.totalorder %v373_v25, 2  ;;  %vm375_vm9 = vcmp.eq.s32.totalorder %v373_v25, 0 }
 0x142   :  { %vm374_vm11 = vcmp.lt.s32.totalorder %v373_v25, 2  ;;  %v662_v55 = vsub.s32 3, %v1296_v50 }
 0x143   :  { %v348_v57 = vclz %v716_v56  ;;  %vm487_vm8 = vcmp.eq.s32.totalorder %v482_v26, 2  ;;  %vm484_vm10 = vcmp.eq.s32.totalorder %v482_v26, 0  ;;  %vm483_vm12 = vcmp.lt.s32.totalorder %v482_v26, 2 }
 0x144   :  { %v672_v56 = vsub.s32 5, %v1296_v50 }
 0x145   :  { %v717_v58 = vadd.s32 4294967294, %v348_v57  ;;  %v667_v57 = vsub.s32 4, %v1296_v50 }
 0x147   :  { %vm718_vm3 = vcmp.lt.s32.totalorder %v717_v58, 0 }
 0x148   :  { %v351_v59 = vsel %vm718_vm3, 0, %v717_v58  ;;  %v677_v58 = vsub.s32 6, %v1296_v50 }
 0x149   :  { %v352_v62 = vsub.s32 32, %v351_v59  ;;  %v356_v63 = vsub.s32 4294967266, %v351_v59  ;;  %v353_v0 = vshll.u32 %v344_v53, %v351_v59  ;;  %v663_v59 = vrot.slane %v1302_v52, %v662_v55 }
 0x14b   :  { %v354_v1 = vshrl.u32 %v336_v61, %v352_v62  ;;  %v357_v2 = vadd.s32 127, %v356_v63  ;;  %v673_v61 = vrot.slane %v1302_v52, %v672_v56 }
 0x14d   :  { %v355_v4 = vor.u32 %v354_v1, %v353_v0  ;;  %v358_v5 = vshll.u32 %v357_v2, 23  ;;  %v668_v0 = vrot.slane %v1302_v52, %v667_v57  ;;  %v678_v1 = vrot.slane %v1302_v52, %v677_v58 }
 0x14f   :  { %v359_v7 = vor.u32 4788187, %v358_v5  ;;  %v362_v11 = vcvt.s32.f32 %v355_v4 }
 0x151   :  { %v360_v9 = vand.u32 2147483647, %v359_v7 }
 0x153   :  { %v363_v12 = vmul.f32 %v362_v11, %v360_v9 }
 0x155   :  { %v364_v15 = vxor.u32 2147483648, %v363_v12 }
 0x157   :  { %v365_v16 = vsel %vm282_vm5, %v364_v15, %v363_v12 }
 0x158   :  { %v368_v18 = vsel %vm281_vm6, %v1308_v3, %v365_v16 }
 0x159   :  { %981 = vcosq.f32 %v368_v18 }
 0x15a   :  { %983 = vsinq.f32 %v368_v18 }
 0x15b   :  { %985 = vpow2.f32 %v273_v21 }
 0x163   :  { %v982_v27 = vpop.eup %981 }
 0x164   :  { %v984_v60 = vpop.eup %983  ;;  %v379_v28 = vxor.u32 2147483648, %v982_v27 }
 0x165   :  { %v376_v31 = vxor.u32 2147483648, %v984_v60  ;;  %v986_v39 = vpop.eup %985 }
 0x166   :  { %v380_v54 = vsel %vm378_vm7, %v379_v28, %v984_v60  ;;  %v489_v32 = vsel %vm487_vm8, %v379_v28, %v984_v60 }
 0x167   :  { %v377_v33 = vsel %vm375_vm9, %v982_v27, %v376_v31  ;;  %v486_v34 = vsel %vm484_vm10, %v982_v27, %v376_v31 }
 0x168   :  { %v381_v35 = vsel %vm374_vm11, %v377_v33, %v380_v54  ;;  %v490_v36 = vsel %vm483_vm12, %v486_v34, %v489_v32 }
 0x169   :  { %v382_v30 = vsel %vm372_vm13, nan, %v381_v35  ;;  %v491_v37 = vsel %vm372_vm13, nan, %v490_v36 }
 0x16a   :  { %v384_v10 = vrot.slane %v382_v30, 2  ;;  %v493_v47 = vrot.slane %v491_v37, 2 }
 0x16c   :  { %v386_v40 = vmul.f32 %v986_v39, %v384_v10  ;;  %v495_v41 = vmul.f32 %v986_v39, %v493_v47 }
 0x16e   :  { %v387_v6 = vadd.f32 %v386_v40, %v181_v38  ;;  %v497_v42 = vrot.slane %v495_v41, 6 }
 0x170   :  { %v499_v43 = vadd.f32 %v497_v42, %v181_v38 }
 0x172   :  { %v500_v44 = vsel %vm85_vm4, %v387_v6, %v499_v43  ;;  %vm680_vm4 = vcmask 517120  }
 0x173   :  { %864 = vmatmul.mubr.msk.f32.vlgmr.msra.gmra.mrb[2].mxu0 %vm509_vm14, %v500_v44 }
 0x246   :  { %v579_v45 = vpop.f32.mrb[2].mxu0 }
 0x247   :  { %v583_v46 = vsub.f32 %v500_v44, %v579_v45  ;;  %v865_v3 = vpop.f32.mrb[3].mxu0 }
 0x249   :  { %v584_v48 = vmul.f32 %v583_v46, %v583_v46 }
 0x24b   :  { %883 = vmatmul.mubr.msk.f32.vlgmr.msra.gmra.mrb[2].mxu1 %vm509_vm14, %v584_v48 }
 0x31e   :  { %v654_v49 = vpop.f32.mrb[2].mxu1 }
 0x31f   :  { %v655_v51 = vadd.f32 1e-05, %v654_v49  ;;  %v884_v53 = vpop.f32.mrb[3].mxu1 }
 0x321   :  { %987 = vrsqrt.f32 %v655_v51 }
 0x32b   :  { %v988_v62 = vpop.eup %987 }
 0x32c   :  { %v659_v63 = vmul.f32 %v988_v62, %v583_v46 }
 0x32e   :  { %v664_v2 = vmul.f32 %v663_v59, %v659_v63  ;;  %v674_v4 = vmul.f32 %v673_v61, %v659_v63 }
 0x330   :  { %v669_v5 = vadd.f32 %v668_v0, %v664_v2  ;;  %v679_v50 = vadd.f32 %v678_v1, %v674_v4 }
 0x332   :  { %681 = vst.msk [vmem:[#allocation2] sm:$0x3] %vm680_vm4, %v669_v5 }
 0x333   :  { %683 = vst.msk [vmem:[#allocation4 - $0x2] sm:$0xc] %vm682_vm15, %v679_v50 }
 0x334   :  { %1000 = shalt.err (!%p997_p4)
}
 0x335   :  { %s1001_s15 = scalar_lea.hbm %s1374_s6, 32 }
 0x336   :  { %p1002_p5 = scmp.ne.s32.totalorder %s1374_s6, %s1001_s15  ;;  %p1005_p6 = scmp.lt.u32.totalorder %s1001_s15, %s1374_s6 }
 0x338   :  { %p1007_p7 = pnand %p1005_p6, %p1002_p5 }
 0x33a   :  { %1010 = shalt.err (!%p1007_p7)
}
 0x33b   :  { %693 = dma.vmem_to_hbm [thread:$0]  %s691_s5, 32, %s1374_s6, [#allocation3]  }
 0x33c   :  { %s1011_s0 = scalar_lea.vmem %s701_s3, 32  ;;  %p1016_p9 = scmp.lt.s32.totalorder %s701_s3, %s701_s3 }
 0x33d   :  { %p1012_p8 = scmp.ne.s32.totalorder %s701_s3, %s1011_s0  ;;  %p1017_p10 = scmp.lt.s32.totalorder %s1011_s0, %s1011_s0 }
 0x33f   :  { %p1018_p11 = por %p1017_p10, %p1016_p9 }
 0x341   :  { %p1019_p12 = pnand %p1018_p11, %p1012_p8 }
 0x343   :  { %1022 = shalt.err (!%p1019_p12)
}
 0x344   :  { %s1023_s22 = scalar_lea.hbm %s1375_s7, 32 }
 0x345   :  { %p1024_p13 = scmp.ne.s32.totalorder %s1375_s7, %s1023_s22  ;;  %p1027_p0 = scmp.lt.u32.totalorder %s1023_s22, %s1375_s7 }
 0x347   :  { %p1029_p1 = pnand %p1027_p0, %p1024_p13 }
 0x349   :  { %1032 = shalt.err (!%p1029_p1)
}
 0x34a   :  { %703 = dma.vmem_to_hbm [thread:$0]  %s701_s3, 32, %s1375_s7, [#allocation5]  }
 0x34b   :  { %1033 = dma.done.wait [#allocation3], 32  }
 0x34c   :  { %1034 = vsyncadd [#allocation3], 4294967264 }
 0x34d   :  { %1035 = dma.done.wait [#allocation5], 32  }
 0x34e   :  { %1036 = vsyncadd [#allocation5], 4294967264 }
 0x34f   :  { %710 = vsyncpa [#allocation3], 1 }
 0x350   :  { %711 = vsyncpa [#allocation5], 1 }

</bundles_post_ra>
